<compile_context>
chip_gen: v7x
topology: tpu7x:2x2x1
jax: 0.10.0
libtpu: 0.0.40
codegen_flags: <defaults>
</compile_context>

<pallas_src>
import functools

import jax
import jax.numpy as jnp
from jax import lax
from jax.experimental import pallas as pl
from jax.experimental.pallas import tpu as pltpu


def _round_up(v, m):
    return (v + m - 1) // m * m


def mlp_kernel(n_real_ref,                                       # SMEM scalar prefetch: [1] int32
               x_ref, w1t_ref, gamma_ref, beta_ref, w2t_ref,     # VMEM input tiles
               o_ref,                                            # VMEM output tile
               stats_ref,                                        # VMEM scratch [2, H_pad] f32
               *, eps, mxu_dtype):
    phase = pl.program_id(0)   # 0: Linear1 + stats accumulate, 1: finalize + apply
    i = pl.program_id(1)       # N-tile index

    # ---- Linear 1 (bias=False): [tile_n, Din_pad] @ [Din_pad, H_pad] on the MXU -------------
    # bf16 operands by default (v6e/v7x MXU sweet spot), f32 accumulation + f32 BN math.
    h = jnp.dot(x_ref[...].astype(mxu_dtype), w1t_ref[...].astype(mxu_dtype),
                preferred_element_type=jnp.float32)              # [tile_n, H_pad] f32

    @pl.when(phase == 0)
    def _():
        @pl.when(i == 0)
        def _():
            stats_ref[...] = jnp.zeros_like(stats_ref)
        # Zero-padded rows contribute 0 to both sums, so dividing by the *real* batch size
        # later gives exact batch statistics.
        stats_ref[0:1, :] = stats_ref[0:1, :] + jnp.sum(h, axis=0, keepdims=True)
        stats_ref[1:2, :] = stats_ref[1:2, :] + jnp.sum(h * h, axis=0, keepdims=True)

    @pl.when(phase == 1)
    def _():
        @pl.when(i == 0)
        def _():
            # Finalize BatchNorm1d (training-mode, biased variance) once; reuse the stats
            # scratch to hold the folded scale/bias for all subsequent tiles.
            inv_n = 1.0 / n_real_ref[0].astype(jnp.float32)
            mean = stats_ref[0:1, :] * inv_n
            ex2 = stats_ref[1:2, :] * inv_n
            var = jnp.maximum(ex2 - mean * mean, 0.0)            # clamp cancellation
            inv_std = lax.rsqrt(var + eps)                       # EUP
            scale = gamma_ref[...] * inv_std
            bias = beta_ref[...] - mean * scale
            stats_ref[0:1, :] = scale
            stats_ref[1:2, :] = bias
        # Fused normalize + affine + ReLU in one elementwise pass.
        h_act = jnp.maximum(h * stats_ref[0:1, :] + stats_ref[1:2, :], 0.0)
        # ---- Linear 2 (bias=False): [tile_n, H_pad] @ [H_pad, Dout_pad] ----------------------
        o_ref[...] = jnp.dot(h_act.astype(mxu_dtype), w2t_ref[...].astype(mxu_dtype),
                             preferred_element_type=jnp.float32).astype(o_ref.dtype)


def prepare_params(w1, gamma, beta, w2):
    """One-time parameter prep (hoisted out of the per-call path).

    PyTorch layouts: w1 [H, D_in], w2 [D_out, H], gamma/beta [H].
    Returns lane-dense (multiple-of-128 feature dims), pre-transposed operands plus the
    static logical dims. Only x is padded per forward call.
    """
    hidden, d_in = w1.shape
    d_out = w2.shape[0]
    d_in_pad = _round_up(d_in, 128)
    h_pad = _round_up(hidden, 128)
    d_out_pad = _round_up(d_out, 128)
    params = dict(
        w1t=jnp.zeros((d_in_pad, h_pad), w1.dtype).at[:d_in, :hidden].set(w1.T),
        w2t=jnp.zeros((h_pad, d_out_pad), w2.dtype).at[:hidden, :d_out].set(w2.T),
        gamma=jnp.zeros((1, h_pad), jnp.float32).at[0, :hidden].set(
            gamma.astype(jnp.float32).reshape(-1)),
        beta=jnp.zeros((1, h_pad), jnp.float32).at[0, :hidden].set(
            beta.astype(jnp.float32).reshape(-1)),
    )
    dims = (d_in, hidden, d_out)   # hashable -> static under jit
    return params, dims


@functools.partial(jax.jit, static_argnums=(2,),
                   static_argnames=("eps", "mxu_dtype", "block_n"))
def mlp_forward(x, params, dims, *, eps=1e-5, mxu_dtype=jnp.bfloat16, block_n=128):
    """x: [N, D_in] float32. params/dims from prepare_params. Returns [N, D_out]."""
    d_in, hidden, d_out = dims
    n = x.shape[0]
    assert x.shape[1] == d_in
    w1t, w2t = params["w1t"], params["w2t"]
    gamma_p, beta_p = params["gamma"], params["beta"]
    d_in_pad, h_pad = w1t.shape
    d_out_pad = w2t.shape[1]

    # N tile: 128 rows here (toy sizes); use 256-512 for f32 on v7x (64 MiB VMEM),
    # 512-1024 on v5e/v6e (128 MiB) at real sizes.
    block_n = _round_up(max(8, block_n), 8)
    n_pad = _round_up(max(n, 1), block_n)
    num_tiles = n_pad // block_n

    # Per-call work: pad only x (zero rows/cols are stat- and output-neutral).
    x_p = jnp.zeros((n_pad, d_in_pad), x.dtype).at[:n, :d_in].set(x)
    n_real = jnp.array([n], jnp.int32)   # runtime SMEM scalar -> no per-N kernel bake

    flops = 2 * n_pad * (2 * d_in_pad * h_pad + h_pad * d_out_pad)
    bytes_accessed = (x_p.size * x_p.dtype.itemsize
                      + w1t.size * w1t.dtype.itemsize
                      + w2t.size * w2t.dtype.itemsize
                      + (gamma_p.size + beta_p.size) * 4
                      + n_pad * d_out_pad * x.dtype.itemsize)

    kernel = functools.partial(mlp_kernel, eps=eps, mxu_dtype=mxu_dtype)

    grid_spec = pltpu.PrefetchScalarGridSpec(
        num_scalar_prefetch=1,
        grid=(2, num_tiles),                       # (phase, N-tile); phase 0 fully precedes 1
        in_specs=[
            pl.BlockSpec((block_n, d_in_pad), lambda p, i, n_ref: (i, 0)),   # x tile
            pl.BlockSpec((d_in_pad, h_pad), lambda p, i, n_ref: (0, 0)),     # w1t (resident)
            pl.BlockSpec((1, h_pad), lambda p, i, n_ref: (0, 0)),            # gamma
            pl.BlockSpec((1, h_pad), lambda p, i, n_ref: (0, 0)),            # beta
            pl.BlockSpec((h_pad, d_out_pad), lambda p, i, n_ref: (0, 0)),    # w2t (resident)
        ],
        # Phase 0 iterations all alias output block (0,0) (never written there); each real
        # output block is written exactly once, by its phase-1 iteration.
        out_specs=pl.BlockSpec((block_n, d_out_pad), lambda p, i, n_ref: (i * p, 0)),
        scratch_shapes=[pltpu.VMEM((2, h_pad), jnp.float32)],   # sum/sumsq -> scale/bias
    )

    out_p = pl.pallas_call(
        kernel,
        out_shape=jax.ShapeDtypeStruct((n_pad, d_out_pad), x.dtype),
        grid_spec=grid_spec,
        compiler_params=pltpu.CompilerParams(
            # Phase order matters; N-tile axis accumulates into shared scratch -> arbitrary.
            dimension_semantics=("arbitrary", "arbitrary"),
        ),
        cost_estimate=pl.CostEstimate(flops=flops, transcendentals=h_pad,
                                      bytes_accessed=bytes_accessed),
    )(n_real, x_p, w1t, gamma_p, beta_p, w2t)

    return out_p[:n, :d_out]


def init_params(key, input_dim, hidden_dim, output_dim, dtype=jnp.float32):
    """PyTorch nn.Linear default init: U(-1/sqrt(fan_in), 1/sqrt(fan_in)); BN gamma=1, beta=0."""
    k1, k2 = jax.random.split(key)
    b1 = 1.0 / (input_dim ** 0.5)
    b2 = 1.0 / (hidden_dim ** 0.5)
    w1 = jax.random.uniform(k1, (hidden_dim, input_dim), dtype, minval=-b1, maxval=b1)
    w2 = jax.random.uniform(k2, (output_dim, hidden_dim), dtype, minval=-b2, maxval=b2)
    gamma = jnp.ones((hidden_dim,), dtype)
    beta = jnp.zeros((hidden_dim,), dtype)
    return w1, gamma, beta, w2


def reference_forward(x, w1, gamma, beta, w2, eps=1e-5):
    hp = lax.Precision.HIGHEST
    h = jnp.dot(x, w1.T, precision=hp)
    mean = jnp.mean(h, axis=0, keepdims=True)
    var = jnp.mean((h - mean) ** 2, axis=0, keepdims=True)   # biased var (PyTorch BN)
    h = (h - mean) / jnp.sqrt(var + eps)
    h = h * gamma.reshape(1, -1) + beta.reshape(1, -1)
    h = jnp.maximum(h, 0.0)
    return jnp.dot(h, w2.T, precision=hp)


if __name__ == "__main__":
    INPUT_DIM, HIDDEN_DIM, OUTPUT_DIM = 16, 32, 16

    key = jax.random.PRNGKey(0)
    kx, kx2, kp = jax.random.split(key, 3)
    w1, gamma, beta, w2 = init_params(kp, INPUT_DIM, HIDDEN_DIM, OUTPUT_DIM)
    params, dims = prepare_params(w1, gamma, beta, w2)   # one-time, hoisted out of the call path

    # Batched GIN-style call: many nodes per kernel launch (fills the MXU M dimension).
    N = 128
    x = jax.random.normal(kx, (N, INPUT_DIM), jnp.float32)
    ref = reference_forward(x, w1, gamma, beta, w2)

    # f32 MXU operands: matches the f32 reference tightly.
    out_f32 = jax.block_until_ready(mlp_forward(x, params, dims, mxu_dtype=jnp.float32))
    assert out_f32.shape == (N, OUTPUT_DIM)
    assert jnp.allclose(out_f32, ref, atol=1e-3, rtol=1e-3), "f32 MXU output mismatch vs reference"

    # Default path: bf16 MXU operands, f32 accumulation + f32 BN math (looser tolerance).
    out_bf16 = jax.block_until_ready(mlp_forward(x, params, dims))
    assert jnp.allclose(out_bf16, ref, atol=5e-2, rtol=5e-2), "bf16 MXU output mismatch vs reference"

    # Ragged batch: BN stats use the runtime n_real scalar, padded rows are stat-neutral.
    x_r = x[:100]
    out_r = jax.block_until_ready(mlp_forward(x_r, params, dims, mxu_dtype=jnp.float32))
    ref_r = reference_forward(x_r, w1, gamma, beta, w2)
    assert out_r.shape == (100, OUTPUT_DIM)
    assert jnp.allclose(out_r, ref_r, atol=1e-3, rtol=1e-3), "ragged-batch output mismatch"

    # Multi-tile batch (3 N-tiles of 128): exercises the accumulate-then-apply BN grid.
    N3 = 300
    x3 = jax.random.normal(kx2, (N3, INPUT_DIM), jnp.float32)
    out3 = jax.block_until_ready(mlp_forward(x3, params, dims, mxu_dtype=jnp.float32))
    ref3 = reference_forward(x3, w1, gamma, beta, w2)
    assert out3.shape == (N3, OUTPUT_DIM)
    assert jnp.allclose(out3, ref3, atol=1e-3, rtol=1e-3), "multi-tile output mismatch"

    print("KERNEL_OK")
</pallas_src>

<mosaic_0001>
module attributes {stable_mosaic.version = 11 : i64} {
  func.func @mlp_kernel(%arg0: i32, %arg1: i32, %arg2: memref<1xi32, #tpu.memory_space<smem>>, %arg3: memref<128x128xf32, #tpu.memory_space<vmem>>, %arg4: memref<128x128xf32, #tpu.memory_space<vmem>>, %arg5: memref<1x128xf32, #tpu.memory_space<vmem>>, %arg6: memref<1x128xf32, #tpu.memory_space<vmem>>, %arg7: memref<128x128xf32, #tpu.memory_space<vmem>>, %arg8: memref<128x128xf32, #tpu.memory_space<vmem>>, %arg9: memref<2x128xf32, #tpu.memory_space<vmem>>) attributes {dimension_semantics = [#tpu.dimension_semantics<arbitrary>, #tpu.dimension_semantics<arbitrary>], iteration_bounds = array<i64: 2, 1>, scalar_prefetch = 1 : i64, scratch_operands = 1 : i64, tpu.core_type = #tpu.core_type<tc>, window_params = [{transform_indices = @transform_0, window_bounds = array<i64: 128, 128>}, {pipeline_mode = #tpu.pipeline_mode<synchronous>, transform_indices = @transform_1, window_bounds = array<i64: 128, 128>}, {pipeline_mode = #tpu.pipeline_mode<synchronous>, transform_indices = @transform_2, window_bounds = array<i64: 1, 128>}, {pipeline_mode = #tpu.pipeline_mode<synchronous>, transform_indices = @transform_3, window_bounds = array<i64: 1, 128>}, {pipeline_mode = #tpu.pipeline_mode<synchronous>, transform_indices = @transform_4, window_bounds = array<i64: 128, 128>}, {transform_indices = @transform_5, window_bounds = array<i64: 128, 128>}]} {
    %c0 = arith.constant 0 : index
    %c0_0 = arith.constant 0 : index
    %0 = vector.load %arg3[%c0, %c0_0] : memref<128x128xf32, #tpu.memory_space<vmem>>, vector<128x128xf32>
    %c0_1 = arith.constant 0 : index
    %c0_2 = arith.constant 0 : index
    %1 = vector.load %arg4[%c0_1, %c0_2] : memref<128x128xf32, #tpu.memory_space<vmem>>, vector<128x128xf32>
    %cst = arith.constant dense<0.000000e+00> : vector<128x128xf32>
    %2 = tpu.matmul %0, %1, %cst {dimension_numbers = #tpu.dot_dimension_numbers<[1], [0], [0], [1], [0, 0, 1, 1], [], []>} : vector<128x128xf32>, vector<128x128xf32>, vector<128x128xf32> -> vector<128x128xf32>
    %c0_i32 = arith.constant 0 : i32
    %3 = arith.cmpi eq, %arg0, %c0_i32 : i32
    %4 = arith.extui %3 : i1 to i32
    %c0_i32_3 = arith.constant 0 : i32
    %5 = arith.cmpi ne, %4, %c0_i32_3 : i32
    scf.if %5 {
      %c0_i32_5 = arith.constant 0 : i32
      %9 = arith.cmpi eq, %arg1, %c0_i32_5 : i32
      %10 = arith.extui %9 : i1 to i32
      %c0_i32_6 = arith.constant 0 : i32
      %11 = arith.cmpi ne, %10, %c0_i32_6 : i32
      scf.if %11 {
        %cst_16 = arith.constant 0.000000e+00 : f32
        %23 = vector.broadcast %cst_16 : f32 to vector<2x128xf32>
        %c0_17 = arith.constant 0 : index
        %c0_18 = arith.constant 0 : index
        %24 = vector.load %arg9[%c0_17, %c0_18] : memref<2x128xf32, #tpu.memory_space<vmem>>, vector<2x128xf32>
        tpu.vector_store %arg9[%c0_17, %c0_18], %23 {strides = array<i32>} : memref<2x128xf32, #tpu.memory_space<vmem>>, vector<2x128xf32>,
      } else {
      }
      %c0_7 = arith.constant 0 : index
      %c0_8 = arith.constant 0 : index
      %12 = vector.load %arg9[%c0_7, %c0_8] : memref<2x128xf32, #tpu.memory_space<vmem>>, vector<1x128xf32>
      %cst_9 = arith.constant dense<0.000000e+00> : vector<128xf32>
      %13 = vector.multi_reduction <add>, %2, %cst_9 [0] : vector<128x128xf32> to vector<128xf32>
      %14 = vector.shape_cast %13 : vector<128xf32> to vector<1x128xf32>
      %15 = arith.addf %12, %14 : vector<1x128xf32>
      %c0_10 = arith.constant 0 : index
      %c0_11 = arith.constant 0 : index
      %16 = vector.load %arg9[%c0_10, %c0_11] : memref<2x128xf32, #tpu.memory_space<vmem>>, vector<1x128xf32>
      tpu.vector_store %arg9[%c0_10, %c0_11], %15 {strides = array<i32>} : memref<2x128xf32, #tpu.memory_space<vmem>>, vector<1x128xf32>,
      %c1 = arith.constant 1 : index
      %c0_12 = arith.constant 0 : index
      %17 = vector.load %arg9[%c1, %c0_12] : memref<2x128xf32, #tpu.memory_space<vmem>>, vector<1x128xf32>
      %18 = arith.mulf %2, %2 : vector<128x128xf32>
      %cst_13 = arith.constant dense<0.000000e+00> : vector<128xf32>
      %19 = vector.multi_reduction <add>, %18, %cst_13 [0] : vector<128x128xf32> to vector<128xf32>
      %20 = vector.shape_cast %19 : vector<128xf32> to vector<1x128xf32>
      %21 = arith.addf %17, %20 : vector<1x128xf32>
      %c1_14 = arith.constant 1 : index
      %c0_15 = arith.constant 0 : index
      %22 = vector.load %arg9[%c1_14, %c0_15] : memref<2x128xf32, #tpu.memory_space<vmem>>, vector<1x128xf32>
      tpu.vector_store %arg9[%c1_14, %c0_15], %21 {strides = array<i32>} : memref<2x128xf32, #tpu.memory_space<vmem>>, vector<1x128xf32>,
    } else {
    }
    %c1_i32 = arith.constant 1 : i32
    %6 = arith.cmpi eq, %arg0, %c1_i32 : i32
    %7 = arith.extui %6 : i1 to i32
    %c0_i32_4 = arith.constant 0 : i32
    %8 = arith.cmpi ne, %7, %c0_i32_4 : i32
    scf.if %8 {
      %c0_i32_5 = arith.constant 0 : i32
      %9 = arith.cmpi eq, %arg1, %c0_i32_5 : i32
      %10 = arith.extui %9 : i1 to i32
      %c0_i32_6 = arith.constant 0 : i32
      %11 = arith.cmpi ne, %10, %c0_i32_6 : i32
      scf.if %11 {
        %c0_16 = arith.constant 0 : index
        %23 = memref.load %arg2[%c0_16] : memref<1xi32, #tpu.memory_space<smem>>
        %24 = arith.sitofp %23 : i32 to f32
        %cst_17 = arith.constant 1.000000e+00 : f32
        %25 = arith.divf %cst_17, %24 : f32
        %c0_18 = arith.constant 0 : index
        %c0_19 = arith.constant 0 : index
        %26 = vector.load %arg9[%c0_18, %c0_19] : memref<2x128xf32, #tpu.memory_space<vmem>>, vector<1x128xf32>
        %27 = vector.broadcast %25 : f32 to vector<1x128xf32>
        %28 = arith.mulf %26, %27 : vector<1x128xf32>
        %c1_20 = arith.constant 1 : index
        %c0_21 = arith.constant 0 : index
        %29 = vector.load %arg9[%c1_20, %c0_21] : memref<2x128xf32, #tpu.memory_space<vmem>>, vector<1x128xf32>
        %30 = vector.broadcast %25 : f32 to vector<1x128xf32>
        %31 = arith.mulf %29, %30 : vector<1x128xf32>
        %32 = arith.mulf %28, %28 : vector<1x128xf32>
        %33 = arith.subf %31, %32 : vector<1x128xf32>
        %cst_22 = arith.constant 0.000000e+00 : f32
        %34 = vector.broadcast %cst_22 : f32 to vector<1x128xf32>
        %35 = arith.maximumf %33, %34 : vector<1x128xf32>
        %cst_23 = arith.constant 9.99999974E-6 : f32
        %36 = vector.broadcast %cst_23 : f32 to vector<1x128xf32>
        %37 = arith.addf %35, %36 : vector<1x128xf32>
        %38 = math.rsqrt %37 : vector<1x128xf32>
        %c0_24 = arith.constant 0 : index
        %c0_25 = arith.constant 0 : index
        %39 = vector.load %arg5[%c0_24, %c0_25] : memref<1x128xf32, #tpu.memory_space<vmem>>, vector<1x128xf32>
        %40 = arith.mulf %39, %38 : vector<1x128xf32>
        %c0_26 = arith.constant 0 : index
        %c0_27 = arith.constant 0 : index
        %41 = vector.load %arg6[%c0_26, %c0_27] : memref<1x128xf32, #tpu.memory_space<vmem>>, vector<1x128xf32>
        %42 = arith.mulf %28, %40 : vector<1x128xf32>
        %43 = arith.subf %41, %42 : vector<1x128xf32>
        %c0_28 = arith.constant 0 : index
        %c0_29 = arith.constant 0 : index
        %44 = vector.load %arg9[%c0_28, %c0_29] : memref<2x128xf32, #tpu.memory_space<vmem>>, vector<1x128xf32>
        tpu.vector_store %arg9[%c0_28, %c0_29], %40 {strides = array<i32>} : memref<2x128xf32, #tpu.memory_space<vmem>>, vector<1x128xf32>,
        %c1_30 = arith.constant 1 : index
        %c0_31 = arith.constant 0 : index
        %45 = vector.load %arg9[%c1_30, %c0_31] : memref<2x128xf32, #tpu.memory_space<vmem>>, vector<1x128xf32>
        tpu.vector_store %arg9[%c1_30, %c0_31], %43 {strides = array<i32>} : memref<2x128xf32, #tpu.memory_space<vmem>>, vector<1x128xf32>,
      } else {
      }
      %c0_7 = arith.constant 0 : index
      %c0_8 = arith.constant 0 : index
      %12 = vector.load %arg9[%c0_7, %c0_8] : memref<2x128xf32, #tpu.memory_space<vmem>>, vector<1x128xf32>
      %13 = vector.broadcast %12 : vector<1x128xf32> to vector<128x128xf32>
      %14 = arith.mulf %2, %13 : vector<128x128xf32>
      %c1 = arith.constant 1 : index
      %c0_9 = arith.constant 0 : index
      %15 = vector.load %arg9[%c1, %c0_9] : memref<2x128xf32, #tpu.memory_space<vmem>>, vector<1x128xf32>
      %16 = vector.broadcast %15 : vector<1x128xf32> to vector<128x128xf32>
      %17 = arith.addf %14, %16 : vector<128x128xf32>
      %cst_10 = arith.constant 0.000000e+00 : f32
      %18 = vector.broadcast %cst_10 : f32 to vector<128x128xf32>
      %19 = arith.maximumf %17, %18 : vector<128x128xf32>
      %c0_11 = arith.constant 0 : index
      %c0_12 = arith.constant 0 : index
      %20 = vector.load %arg7[%c0_11, %c0_12] : memref<128x128xf32, #tpu.memory_space<vmem>>, vector<128x128xf32>
      %cst_13 = arith.constant dense<0.000000e+00> : vector<128x128xf32>
      %21 = tpu.matmul %19, %20, %cst_13 {dimension_numbers = #tpu.dot_dimension_numbers<[1], [0], [0], [1], [0, 0, 1, 1], [], []>} : vector<128x128xf32>, vector<128x128xf32>, vector<128x128xf32> -> vector<128x128xf32>
      %c0_14 = arith.constant 0 : index
      %c0_15 = arith.constant 0 : index
      %22 = vector.load %arg8[%c0_14, %c0_15] : memref<128x128xf32, #tpu.memory_space<vmem>>, vector<128x128xf32>
      tpu.vector_store %arg8[%c0_14, %c0_15], %21 {strides = array<i32>} : memref<128x128xf32, #tpu.memory_space<vmem>>, vector<128x128xf32>,
    } else {
    }
    return
  }
  func.func @transform_0(%arg0: i32, %arg1: i32, %arg2: memref<1xi32, #tpu.memory_space<smem>>) -> (i32, i32) {
    %c0_i32 = arith.constant 0 : i32
    %c0_i32_0 = arith.constant 0 : i32
    return %arg1, %c0_i32 : i32, i32
  }
  func.func @transform_1(%arg0: i32, %arg1: i32, %arg2: memref<1xi32, #tpu.memory_space<smem>>) -> (i32, i32) {
    %c0_i32 = arith.constant 0 : i32
    %c0_i32_0 = arith.constant 0 : i32
    %c0_i32_1 = arith.constant 0 : i32
    return %c0_i32, %c0_i32_0 : i32, i32
  }
  func.func @transform_2(%arg0: i32, %arg1: i32, %arg2: memref<1xi32, #tpu.memory_space<smem>>) -> (i32, i32) {
    %c0_i32 = arith.constant 0 : i32
    %c0_i32_0 = arith.constant 0 : i32
    %c0_i32_1 = arith.constant 0 : i32
    return %c0_i32, %c0_i32_0 : i32, i32
  }
  func.func @transform_3(%arg0: i32, %arg1: i32, %arg2: memref<1xi32, #tpu.memory_space<smem>>) -> (i32, i32) {
    %c0_i32 = arith.constant 0 : i32
    %c0_i32_0 = arith.constant 0 : i32
    %c0_i32_1 = arith.constant 0 : i32
    return %c0_i32, %c0_i32_0 : i32, i32
  }
  func.func @transform_4(%arg0: i32, %arg1: i32, %arg2: memref<1xi32, #tpu.memory_space<smem>>) -> (i32, i32) {
    %c0_i32 = arith.constant 0 : i32
    %c0_i32_0 = arith.constant 0 : i32
    %c0_i32_1 = arith.constant 0 : i32
    return %c0_i32, %c0_i32_0 : i32, i32
  }
  func.func @transform_5(%arg0: i32, %arg1: i32, %arg2: memref<1xi32, #tpu.memory_space<smem>>) -> (i32, i32) {
    %0 = arith.muli %arg1, %arg0 : i32
    %c0_i32 = arith.constant 0 : i32
    %c0_i32_0 = arith.constant 0 : i32
    return %0, %c0_i32 : i32, i32
  }
}

</mosaic_0001>

<bundles_post_ra>
// kernel: mlp_forward.1
= control target key start
LH: loop header
LB: loop body
LE: loop exit
PB: predicated region body
PF: predicated region fallthrough
CT: control target
= control target key end

     0   :  { %s1212_s23 = smov 0   ;;  %s1214_s24 = smov 0   ;;  %s1537_s0 = inlined_call_operand.<no memory space> [shape: s32[1], index: 0, kind: input, shape index: {}]   ;;  %s1538_s1 = inlined_call_operand.vmem [shape: f32[128,128], index: 1, kind: input, shape index: {}]   ;;  %s1539_s2 = inlined_call_operand.vmem [shape: f32[128,128], index: 2, kind: input, shape index: {}]   ;;  %s1540_s3 = inlined_call_operand.vmem [shape: f32[1,128], index: 3, kind: input, shape index: {}]   ;;  %s1541_s4 = inlined_call_operand.vmem [shape: f32[1,128], index: 4, kind: input, shape index: {}]   ;;  %s1542_s5 = inlined_call_operand.vmem [shape: f32[128,128], index: 5, kind: input, shape index: {}]   ;;  %s1543_s6 = inlined_call_operand.vmem [shape: f32[128,128], index: 6, kind: output, shape index: {}]  }
   0x1   :  { %11 = sst [smem:[#allocation4]] %s1537_s0  ;;  %s1216_s25 = smov 0  }
   0x2 LB: > { %s29_s0 = sadd.s32 1, %s1167_s24  ;;  %p837_p0 = scmp.ge.s32.totalorder %s1171_s25, 1  ;;  %s1171_s25 = sphi %s1216_s25, %s17_s25   ;;  %s1167_s24 = sphi %s1214_s24, %s1545_s24   ;;  %s1163_s23 = sphi %s1212_s23, %s1544_s23  }
   0x3   : > { %p31_p1 = scmp.ge.s32.totalorder %s29_s0, 2  ;;  %p204_p2 = scmp.lt.s32.totalorder %s1171_s25, 3 }
   0x5   : > { %s1547_s0 = smov (%p31_p1, %s29_s0), 0  ;;  %p205_p3 = pnand %p837_p0, %p204_p2 }
   0x6   : > { %v263_v0 = vld [vmem:[%s1539_s2] sm:$0xff] (!%p205_p3)  ;;  %v264_v1 = vld [vmem:[%s1539_s2 + $0x8] sm:$0xff] (!%p205_p3)  ;;  %v265_v2 = vld [vmem:[%s1539_s2 + $0x10] sm:$0xff] (!%p205_p3)  ;;  %p838_p4 = scmp.ne.s32.totalorder (!%p205_p3), %s1163_s23, 0 }
   0x7   : > { %208 = sbr.rel (%p205_p3) target bundleno = 641 (0x281), region = 40  ;;  %v1022_v3 = vpack.c.bf16 (!%p205_p3), %v264_v1, %v263_v0  ;;  %v266_v4 = vld [vmem:[%s1539_s2 + $0x18] sm:$0xff] (!%p205_p3)  ;;  %v267_v6 = vld [vmem:[%s1539_s2 + $0x20] sm:$0xff] (!%p205_p3)  ;;  %v268_v7 = vld [vmem:[%s1539_s2 + $0x28] sm:$0xff] (!%p205_p3) }
   0x8   : > { %v1026_v5 = vpack.c.bf16 (!%p205_p3), %v266_v4, %v265_v2  ;;  %v1030_v8 = vpack.c.bf16 (!%p205_p3), %v268_v7, %v267_v6  ;;  %v247_v9 = vld [vmem:[%s1538_s1] sm:$0xff] (!%p205_p3)  ;;  %v269_v11 = vld [vmem:[%s1539_s2 + $0x30] sm:$0xff] (!%p205_p3)  ;;  %v270_v12 = vld [vmem:[%s1539_s2 + $0x38] sm:$0xff] (!%p205_p3) }
   0x9   : > { %1023 = vmatprep.subr.bf16.mxu0 (!%p205_p3), %v1022_v3  ;;  %1086 = vmatprep.subr.bf16.mxu1 (!%p205_p3), %v1022_v3  ;;  %v255_v10 = vld [vmem:[%s1538_s1 + $0x40] sm:$0xff] (!%p205_p3)  ;;  %v1034_v13 = vpack.c.bf16 (!%p205_p3), %v270_v12, %v269_v11  ;;  %v272_v15 = vld [vmem:[%s1539_s2 + $0x48] sm:$0xff] (!%p205_p3)  ;;  %v273_v17 = vld [vmem:[%s1539_s2 + $0x50] sm:$0xff] (!%p205_p3) }
   0xa   : > { %1025 = vmatpush3.bf16.msra.mxu0 (!%p205_p3), %v1022_v3  ;;  %1094 = vmatpush3.bf16.msra.mxu1 (!%p205_p3), %v1022_v3  ;;  %v271_v14 = vld [vmem:[%s1539_s2 + $0x40] sm:$0xff] (!%p205_p3)  ;;  %v274_v18 = vld [vmem:[%s1539_s2 + $0x58] sm:$0xff] (!%p205_p3)  ;;  %v276_v21 = vld [vmem:[%s1539_s2 + $0x68] sm:$0xff] (!%p205_p3) }
   0xb   : > { %1027 = vmatprep.subr.bf16.mxu0 (!%p205_p3), %v1026_v5  ;;  %1087 = vmatprep.subr.bf16.mxu1 (!%p205_p3), %v1026_v5  ;;  %v1038_v16 = vpack.c.bf16 (!%p205_p3), %v272_v15, %v271_v14  ;;  %v1042_v19 = vpack.c.bf16 (!%p205_p3), %v274_v18, %v273_v17  ;;  %v275_v20 = vld [vmem:[%s1539_s2 + $0x60] sm:$0xff] (!%p205_p3)  ;;  %v277_v23 = vld [vmem:[%s1539_s2 + $0x70] sm:$0xff] (!%p205_p3)  ;;  %v278_v24 = vld [vmem:[%s1539_s2 + $0x78] sm:$0xff] (!%p205_p3) }
   0xc   : > { %942 = vmatprep.mubr.f32.mxu0 (!%p205_p3), %v247_v9  ;;  %954 = vmatprep.mubr.f32.mxu1 (!%p205_p3), %v255_v10  ;;  %v1046_v22 = vpack.c.bf16 (!%p205_p3), %v276_v21, %v275_v20  ;;  %v1050_v25 = vpack.c.bf16 (!%p205_p3), %v278_v24, %v277_v23  ;;  %v248_v26 = vld [vmem:[%s1538_s1 + $0x8] sm:$0xff] (!%p205_p3)  ;;  %v249_v28 = vld [vmem:[%s1538_s1 + $0x10] sm:$0xff] (!%p205_p3)  ;;  %v250_v30 = vld [vmem:[%s1538_s1 + $0x18] sm:$0xff] (!%p205_p3) }
   0xd   : > { %v256_v27 = vld [vmem:[%s1538_s1 + $0x48] sm:$0xff] (!%p205_p3)  ;;  %v257_v29 = vld [vmem:[%s1538_s1 + $0x50] sm:$0xff] (!%p205_p3)  ;;  %v258_v31 = vld [vmem:[%s1538_s1 + $0x58] sm:$0xff] (!%p205_p3) }
   0xe   : > { %1029 = vmatpush3.bf16.msra.mxu0 %v1026_v5  ;;  %1095 = vmatpush3.bf16.msra.mxu1 %v1026_v5  ;;  %v251_v32 = vld [vmem:[%s1538_s1 + $0x20] sm:$0xff]  ;;  %v252_v34 = vld [vmem:[%s1538_s1 + $0x28] sm:$0xff]  ;;  %v253_v36 = vld [vmem:[%s1538_s1 + $0x30] sm:$0xff]  ;;  %v1173_v57 = vmov (!%p838_p4), 0.0  }
   0xf   : > { %1031 = vmatprep.subr.bf16.mxu0 %v1030_v8  ;;  %1088 = vmatprep.subr.bf16.mxu1 %v1030_v8  ;;  %v259_v33 = vld [vmem:[%s1538_s1 + $0x60] sm:$0xff]  ;;  %v260_v35 = vld [vmem:[%s1538_s1 + $0x68] sm:$0xff]  ;;  %v261_v37 = vld [vmem:[%s1538_s1 + $0x70] sm:$0xff]  ;;  %432 = vst [vmem:[#allocation2] sm:$0x3] (!%p838_p4), %v1173_v57 }
  0x10   : > { %v254_v38 = vld [vmem:[%s1538_s1 + $0x38] sm:$0xff] }
  0x11   : > { %v262_v39 = vld [vmem:[%s1538_s1 + $0x78] sm:$0xff] }
  0x12   : > { %1033 = vmatpush3.bf16.msra.mxu0 %v1030_v8  ;;  %1096 = vmatpush3.bf16.msra.mxu1 %v1030_v8 }
  0x13   : > { %1035 = vmatprep.subr.bf16.mxu0 %v1034_v13  ;;  %1089 = vmatprep.subr.bf16.mxu1 %v1034_v13 }
  0x16   : > { %1037 = vmatpush3.bf16.msra.mxu0 %v1034_v13  ;;  %1097 = vmatpush3.bf16.msra.mxu1 %v1034_v13 }
  0x17   : > { %1039 = vmatprep.subr.bf16.mxu0 %v1038_v16  ;;  %1090 = vmatprep.subr.bf16.mxu1 %v1038_v16 }
  0x1a   : > { %1041 = vmatpush3.bf16.msra.mxu0 %v1038_v16  ;;  %1098 = vmatpush3.bf16.msra.mxu1 %v1038_v16 }
  0x1b   : > { %1043 = vmatprep.subr.bf16.mxu0 %v1042_v19  ;;  %1091 = vmatprep.subr.bf16.mxu1 %v1042_v19 }
  0x1e   : > { %1045 = vmatpush3.bf16.msra.mxu0 %v1042_v19  ;;  %1099 = vmatpush3.bf16.msra.mxu1 %v1042_v19 }
  0x1f   : > { %1047 = vmatprep.subr.bf16.mxu0 %v1046_v22  ;;  %1092 = vmatprep.subr.bf16.mxu1 %v1046_v22 }
  0x22   : > { %1049 = vmatpush3.bf16.msra.mxu0 %v1046_v22  ;;  %1100 = vmatpush3.bf16.msra.mxu1 %v1046_v22 }
  0x23   : > { %1051 = vmatprep.subr.bf16.mxu0 %v1050_v25  ;;  %1093 = vmatprep.subr.bf16.mxu1 %v1050_v25 }
  0x26   : > { %1053 = vmatpush3.bf16.msra.mxu0 %v1050_v25  ;;  %1101 = vmatpush3.bf16.msra.mxu1 %v1050_v25 }
  0x29   : > { %943 = vmatmul.mubr.f32.vlgmr.msra.gmra.mrb[0].mxu0 %v248_v26  ;;  %955 = vmatmul.mubr.f32.vlgmr.msra.gmra.mrb[0].mxu1 %v256_v27 }
  0x2a   : > { %945 = vmatprep.mubr.f32.mxu0 %v249_v28  ;;  %957 = vmatprep.mubr.f32.mxu1 %v257_v29 }
  0x2d   : > { %946 = vmatmul.mubr.f32.gmra.mrb[2].mxu0 %v250_v30  ;;  %958 = vmatmul.mubr.f32.gmra.mrb[2].mxu1 %v258_v31 }
  0x2e   : > { %948 = vmatprep.mubr.f32.mxu0 %v251_v32  ;;  %960 = vmatprep.mubr.f32.mxu1 %v259_v33 }
  0x31   : > { %949 = vmatmul.mubr.f32.gmra.mrb[4].mxu0 %v252_v34  ;;  %961 = vmatmul.mubr.f32.gmra.mrb[4].mxu1 %v260_v35 }
  0x32   : > { %951 = vmatprep.mubr.f32.mxu0 %v253_v36  ;;  %963 = vmatprep.mubr.f32.mxu1 %v261_v37 }
  0x35   : > { %952 = vmatmul.mubr.f32.gmra.mrb[6].mxu0 %v254_v38  ;;  %964 = vmatmul.mubr.f32.gmra.mrb[6].mxu1 %v262_v39 }
  0xfc   : > { %v1328_v40 = vpop.f32.mrb[0].mxu0  ;;  %v1330_v41 = vpop.f32.mrb[0].mxu1 }
  0xfd   : > { %v1332_v42 = vpop.f32.mrb[1].mxu0  ;;  %v1334_v43 = vpop.f32.mrb[1].mxu1  ;;  %v459_v59 = vmul.f32 (!%p838_p4), %v1328_v40, %v1328_v40  ;;  %v467_v17 = vmul.f32 (!%p838_p4), %v1330_v41, %v1330_v41 }
  0xfe   : > { %v434_v56 = vadd.f32 (!%p838_p4), %v1328_v40, %v1332_v42  ;;  %v458_v58 = vmul.f32 (!%p838_p4), %v1332_v42, %v1332_v42  ;;  %v466_v14 = vmul.f32 (!%p838_p4), %v1334_v43, %v1334_v43 }
 0x100   : > { %v1336_v44 = vpop.f32.mrb[2].mxu0  ;;  %v1338_v45 = vpop.f32.mrb[2].mxu1  ;;  %v474_v0 = vadd.f32 (!%p838_p4), %v459_v59, %v458_v58 }
 0x101   : > { %v1340_v46 = vpop.f32.mrb[3].mxu0  ;;  %v1342_v47 = vpop.f32.mrb[3].mxu1  ;;  %v461_v63 = vmul.f32 (!%p838_p4), %v1336_v44, %v1336_v44  ;;  %v469_v23 = vmul.f32 (!%p838_p4), %v1338_v45, %v1338_v45 }
 0x102   : > { %v435_v60 = vadd.f32 (!%p838_p4), %v434_v56, %v1340_v46  ;;  %v460_v61 = vmul.f32 (!%p838_p4), %v1340_v46, %v1340_v46  ;;  %v468_v20 = vmul.f32 (!%p838_p4), %v1342_v47, %v1342_v47 }
 0x103   : > { %427 = sbr.rel (%p838_p4) target bundleno = 303 (0x12f), region = 44 }
 0x104   : > { %v1344_v48 = vpop.f32.mrb[4].mxu0  ;;  %v1346_v49 = vpop.f32.mrb[4].mxu1  ;;  %v436_v62 = vadd.f32 (!%p838_p4), %v1336_v44, %v435_v60  ;;  %v475_v3 = vadd.f32 (!%p838_p4), %v474_v0, %v460_v61 }
 0x105   : > { %v1348_v50 = vpop.f32.mrb[5].mxu0  ;;  %v1350_v51 = vpop.f32.mrb[5].mxu1  ;;  %v463_v5 = vmul.f32 (!%p838_p4), %v1344_v48, %v1344_v48  ;;  %v471_v29 = vmul.f32 (!%p838_p4), %v1346_v49, %v1346_v49 }
 0x106   : > { %v437_v1 = vadd.f32 (!%p838_p4), %v436_v62, %v1348_v50  ;;  %v462_v2 = vmul.f32 (!%p838_p4), %v1348_v50, %v1348_v50  ;;  %v476_v6 = vadd.f32 (!%p838_p4), %v475_v3, %v461_v63  ;;  %v470_v26 = vmul.f32 (!%p838_p4), %v1350_v51, %v1350_v51  ;;  %v433_v62 = vld [vmem:[#allocation2] sm:$0x1] (!%p838_p4) }
 0x108   : > { %v1352_v52 = vpop.f32.mrb[6].mxu0  ;;  %v1354_v53 = vpop.f32.mrb[6].mxu1  ;;  %v438_v4 = vadd.f32 (!%p838_p4), %v1344_v48, %v437_v1  ;;  %v477_v9 = vadd.f32 (!%p838_p4), %v476_v6, %v462_v2 }
 0x109   : > { %v1356_v54 = vpop.f32.mrb[7].mxu0  ;;  %v1358_v55 = vpop.f32.mrb[7].mxu1  ;;  %v465_v11 = vmul.f32 (!%p838_p4), %v1352_v52, %v1352_v52  ;;  %v473_v35 = vmul.f32 (!%p838_p4), %v1354_v53, %v1354_v53 }
 0x10a   : > { %v439_v7 = vadd.f32 %v438_v4, %v1356_v54  ;;  %v464_v8 = vmul.f32 %v1356_v54, %v1356_v54  ;;  %v478_v12 = vadd.f32 %v477_v9, %v463_v5  ;;  %v472_v32 = vmul.f32 %v1358_v55, %v1358_v55  ;;  %v457_v4 = vld [vmem:[#allocation2 + $0x1] sm:$0x1] }
 0x10c   : > { %v440_v10 = vadd.f32 %v1352_v52, %v439_v7  ;;  %v479_v15 = vadd.f32 %v478_v12, %v464_v8 }
 0x10e   : > { %v441_v13 = vadd.f32 %v440_v10, %v1334_v43  ;;  %v480_v18 = vadd.f32 %v479_v15, %v465_v11 }
 0x110   : > { %v442_v16 = vadd.f32 %v1330_v41, %v441_v13  ;;  %v481_v21 = vadd.f32 %v480_v18, %v466_v14 }
 0x112   : > { %v443_v19 = vadd.f32 %v442_v16, %v1342_v47  ;;  %v482_v24 = vadd.f32 %v481_v21, %v467_v17 }
 0x114   : > { %v444_v22 = vadd.f32 %v1338_v45, %v443_v19  ;;  %v483_v27 = vadd.f32 %v482_v24, %v468_v20 }
 0x116   : > { %v445_v25 = vadd.f32 %v444_v22, %v1350_v51  ;;  %v484_v30 = vadd.f32 %v483_v27, %v469_v23 }
 0x118   : > { %v446_v28 = vadd.f32 %v1346_v49, %v445_v25  ;;  %v485_v33 = vadd.f32 %v484_v30, %v470_v26 }
 0x11a   : > { %v447_v31 = vadd.f32 %v446_v28, %v1358_v55  ;;  %v486_v36 = vadd.f32 %v485_v33, %v471_v29 }
 0x11c   : > { %v448_v34 = vadd.f32 %v1354_v53, %v447_v31  ;;  %v487_v38 = vadd.f32 %v486_v36, %v472_v32 }
 0x11e   : > { %v449_v37 = vrot.slane %v448_v34, 4  ;;  %v488_v56 = vadd.f32 %v487_v38, %v473_v35 }
 0x120   : > { %v450_v39 = vadd.f32 %v449_v37, %v448_v34  ;;  %v489_v58 = vrot.slane %v488_v56, 4 }
 0x122   : > { %v451_v57 = vrot.slane %v450_v39, 2  ;;  %v490_v60 = vadd.f32 %v489_v58, %v488_v56 }
 0x124   : > { %v452_v59 = vadd.f32 %v451_v57, %v450_v39  ;;  %v491_v63 = vrot.slane %v490_v60, 2 }
 0x126   : > { %v453_v61 = vrot.slane %v452_v59, 1  ;;  %v492_v1 = vadd.f32 %v491_v63, %v490_v60 }
 0x128   : > { %v454_v0 = vadd.f32 %v453_v61, %v452_v59  ;;  %v493_v3 = vrot.slane %v492_v1, 1 }
 0x12a   : > { %v455_v2 = vadd.f32 %v454_v0, %v433_v62  ;;  %v494_v5 = vadd.f32 %v493_v3, %v492_v1 }
 0x12c   : > { %456 = vst [vmem:[#allocation2] sm:$0x1] %v455_v2  ;;  %v495_v6 = vadd.f32 %v494_v5, %v457_v4 }
 0x12e   : > { %496 = vst [vmem:[#allocation2 + $0x1] sm:$0x1] %v495_v6 }
 0x12f PF: > { %p839_p5 = scmp.ne.s32.totalorder %s1163_s23, 1 }
 0x130   : > { %s505_s27 = sld [smem:[#allocation4]] (!%p839_p5)  ;;  %v585_v7 = vld [vmem:[%s1542_s5] sm:$0xff] (!%p839_p5)  ;;  %v586_v8 = vld [vmem:[%s1542_s5 + $0x8] sm:$0xff] (!%p839_p5)  ;;  %v587_v9 = vld [vmem:[%s1542_s5 + $0x10] sm:$0xff] (!%p839_p5) }
 0x131   : > { %500 = sbr.rel (%p839_p5) target bundleno = 641 (0x281), region = 52  ;;  %v588_v10 = vld [vmem:[%s1542_s5 + $0x18] sm:$0xff] (!%p839_p5)  ;;  %v1054_v11 = vpack.c.bf16 (!%p839_p5), %v586_v8, %v585_v7  ;;  %v589_v13 = vld [vmem:[%s1542_s5 + $0x20] sm:$0xff] (!%p839_p5)  ;;  %v590_v14 = vld [vmem:[%s1542_s5 + $0x28] sm:$0xff] (!%p839_p5) }
 0x132   : > { %v1058_v12 = vpack.c.bf16 (!%p839_p5), %v588_v10, %v587_v9  ;;  %v1062_v15 = vpack.c.bf16 (!%p839_p5), %v590_v14, %v589_v13  ;;  %v591_v17 = vld [vmem:[%s1542_s5 + $0x30] sm:$0xff] (!%p839_p5)  ;;  %v592_v18 = vld [vmem:[%s1542_s5 + $0x38] sm:$0xff] (!%p839_p5)  ;;  %v593_v20 = vld [vmem:[%s1542_s5 + $0x40] sm:$0xff] (!%p839_p5) }
 0x133   : > { %1055 = vmatprep.subr.bf16.mxu0 (!%p839_p5), %v1054_v11  ;;  %1102 = vmatprep.subr.bf16.mxu1 (!%p839_p5), %v1054_v11  ;;  %v1066_v19 = vpack.c.bf16 (!%p839_p5), %v592_v18, %v591_v17  ;;  %v594_v21 = vld [vmem:[%s1542_s5 + $0x48] sm:$0xff] (!%p839_p5)  ;;  %v595_v23 = vld [vmem:[%s1542_s5 + $0x50] sm:$0xff] (!%p839_p5)  ;;  %v596_v24 = vld [vmem:[%s1542_s5 + $0x58] sm:$0xff] (!%p839_p5) }
 0x134   : > { %1057 = vmatpush3.bf16.msra.mxu0 (!%p839_p5), %v1054_v11  ;;  %1110 = vmatpush3.bf16.msra.mxu1 (!%p839_p5), %v1054_v11  ;;  %v1070_v22 = vpack.c.bf16 (!%p839_p5), %v594_v21, %v593_v20  ;;  %v1074_v26 = vpack.c.bf16 (!%p839_p5), %v596_v24, %v595_v23  ;;  %v597_v27 = vld [vmem:[%s1542_s5 + $0x60] sm:$0xff] (!%p839_p5)  ;;  %v598_v28 = vld [vmem:[%s1542_s5 + $0x68] sm:$0xff] (!%p839_p5)  ;;  %v599_v30 = vld [vmem:[%s1542_s5 + $0x70] sm:$0xff] (!%p839_p5) }
 0x135   : > { %1059 = vmatprep.subr.bf16.mxu0 (!%p839_p5), %v1058_v12  ;;  %1103 = vmatprep.subr.bf16.mxu1 (!%p839_p5), %v1058_v12  ;;  %v1078_v29 = vpack.c.bf16 (!%p839_p5), %v598_v28, %v597_v27  ;;  %v600_v31 = vld [vmem:[%s1542_s5 + $0x78] sm:$0xff] (!%p839_p5)  ;;  %v510_v33 = vld [vmem:[#allocation2] sm:$0x1] (!%p839_p5)  ;;  %v513_v35 = vld [vmem:[#allocation2 + $0x1] sm:$0x1] (!%p839_p5) }
 0x136   : > { %s506_s15 = scvt.s32.f32 (!%p839_p5), %s505_s27  ;;  %v1082_v32 = vpack.c.bf16 (!%p839_p5), %v600_v31, %v599_v30  ;;  %v520_v58 = vld [vmem:[%s1540_s3] sm:$0x1] (!%p839_p5) }
 0x137   : > { %v522_v61 = vld [vmem:[%s1541_s4] sm:$0x1] (!%p839_p5) }
 0x138   : > { %v507_v16 = vstv %s506_s15  ;;  %1061 = vmatpush3.bf16.msra.mxu0 %v1058_v12  ;;  %1111 = vmatpush3.bf16.msra.mxu1 %v1058_v12 }
 0x139   : > { %1145 = vrcp.f32 %v507_v16  ;;  %1063 = vmatprep.subr.bf16.mxu0 %v1062_v15  ;;  %1104 = vmatprep.subr.bf16.mxu1 %v1062_v15 }
 0x13c   : > { %1065 = vmatpush3.bf16.msra.mxu0 %v1062_v15  ;;  %1112 = vmatpush3.bf16.msra.mxu1 %v1062_v15 }
 0x13d   : > { %1067 = vmatprep.subr.bf16.mxu0 %v1066_v19  ;;  %1105 = vmatprep.subr.bf16.mxu1 %v1066_v19 }
 0x140   : > { %1069 = vmatpush3.bf16.msra.mxu0 %v1066_v19  ;;  %1113 = vmatpush3.bf16.msra.mxu1 %v1066_v19 }
 0x141   : > { %1071 = vmatprep.subr.bf16.mxu0 %v1070_v22  ;;  %1106 = vmatprep.subr.bf16.mxu1 %v1070_v22 }
 0x143   : > { %v1146_v25 = vpop.eup %1145 }
 0x144   : > { %1118 = vpush %v1146_v25  ;;  %1073 = vmatpush3.bf16.msra.mxu0 %v1070_v22  ;;  %1114 = vmatpush3.bf16.msra.mxu1 %v1070_v22 }
 0x145   : > { %1075 = vmatprep.subr.bf16.mxu0 %v1074_v26  ;;  %1107 = vmatprep.subr.bf16.mxu1 %v1074_v26 }
 0x148   : > { %1077 = vmatpush3.bf16.msra.mxu0 %v1074_v26  ;;  %1115 = vmatpush3.bf16.msra.mxu1 %v1074_v26 }
 0x149   : > { %1079 = vmatprep.subr.bf16.mxu0 %v1078_v29  ;;  %1108 = vmatprep.subr.bf16.mxu1 %v1078_v29 }
 0x14c   : > { %1081 = vmatpush3.bf16.msra.mxu0 %v1078_v29  ;;  %1116 = vmatpush3.bf16.msra.mxu1 %v1078_v29 }
 0x14d   : > { %1083 = vmatprep.subr.bf16.mxu0 %v1082_v32  ;;  %1109 = vmatprep.subr.bf16.mxu1 %v1082_v32 }
 0x150   : > { %1085 = vmatpush3.bf16.msra.mxu0 %v1082_v32  ;;  %1117 = vmatpush3.bf16.msra.mxu1 %v1082_v32 }
 0x175   : > { %s1119_s14 = spop %1118 }
 0x176   : > { %v511_v34 = vstv %s1119_s14 }
 0x177   : > { %v512_v36 = vmul.f32 %v511_v34, %v510_v33  ;;  %v514_v37 = vmul.f32 %v513_v35, %v511_v34 }
 0x179   : > { %v515_v38 = vmul.f32 %v512_v36, %v512_v36 }
 0x17b   : > { %v516_v39 = vsub.f32 %v514_v37, %v515_v38 }
 0x17d   : > { %v517_v56 = vmax.f32 %v516_v39, 0.0 }
 0x17f   : > { %v518_v57 = vadd.f32 1e-05, %v517_v56 }
 0x181   : > { %1147 = vrsqrt.f32 %v518_v57 }
 0x18b   : > { %v1148_v59 = vpop.eup %1147 }
 0x18c   : > { %v521_v60 = vmul.f32 %v1148_v59, %v520_v58 }
 0x18e   : > { %v523_v62 = vmul.f32 %v521_v60, %v512_v36  ;;  %525 = vst [vmem:[#allocation2] sm:$0x1] %v521_v60 }
 0x190   : > { %v524_v63 = vsub.f32 %v522_v61, %v523_v62 }
 0x192   : > { %526 = vst [vmem:[#allocation2 + $0x1] sm:$0x1] %v524_v63 }
 0x195   : > { %v840_v0 = vld [vmem:[#allocation2] ss:$0 sm:$0xff] }
 0x196   : > { %v532_v1 = vmul.f32 %v840_v0, %v1332_v42  ;;  %v540_v2 = vmul.f32 %v840_v0, %v1334_v43  ;;  %v533_v3 = vmul.f32 %v1328_v40, %v840_v0  ;;  %v541_v4 = vmul.f32 %v1330_v41, %v840_v0 }
 0x197   : > { %v534_v6 = vmul.f32 %v840_v0, %v1340_v46  ;;  %v542_v7 = vmul.f32 %v840_v0, %v1342_v47  ;;  %v535_v8 = vmul.f32 %v1336_v44, %v840_v0  ;;  %v543_v9 = vmul.f32 %v1338_v45, %v840_v0 }
 0x198   : > { %v536_v43 = vmul.f32 %v840_v0, %v1348_v50  ;;  %v544_v40 = vmul.f32 %v840_v0, %v1350_v51  ;;  %v537_v20 = vmul.f32 %v1344_v48, %v840_v0  ;;  %v545_v50 = vmul.f32 %v1346_v49, %v840_v0 }
 0x199   : > { %v841_v5 = vld [vmem:[#allocation2 + $0x1] ss:$0 sm:$0xff]  ;;  %v538_v51 = vmul.f32 %v840_v0, %v1356_v54  ;;  %v546_v21 = vmul.f32 %v840_v0, %v1358_v55  ;;  %v539_v48 = vmul.f32 %v1352_v52, %v840_v0  ;;  %v547_v49 = vmul.f32 %v1354_v53, %v840_v0 }
 0x19a   : > { %v553_v10 = vadd.f32 %v841_v5, %v532_v1  ;;  %v561_v11 = vadd.f32 %v841_v5, %v540_v2  ;;  %v554_v12 = vadd.f32 %v841_v5, %v533_v3  ;;  %v562_v13 = vadd.f32 %v841_v5, %v541_v4 }
 0x19b   : > { %v555_v42 = vadd.f32 %v841_v5, %v534_v6  ;;  %v563_v14 = vadd.f32 %v841_v5, %v542_v7  ;;  %v556_v17 = vadd.f32 %v841_v5, %v535_v8  ;;  %v564_v47 = vadd.f32 %v841_v5, %v543_v9 }
 0x19c   : > { %v569_v41 = vmax.f32 %v553_v10, 0.0  ;;  %v577_v15 = vmax.f32 %v561_v11, 0.0  ;;  %v570_v16 = vmax.f32 %v554_v12, 0.0  ;;  %v578_v46 = vmax.f32 %v562_v13, 0.0 }
 0x19d   : > { %v571_v44 = vmax.f32 %v555_v42, 0.0  ;;  %v579_v45 = vmax.f32 %v563_v14, 0.0  ;;  %v557_v18 = vadd.f32 %v841_v5, %v536_v43  ;;  %v565_v19 = vadd.f32 %v841_v5, %v544_v40 }
 0x19e   : > { %998 = vmatprep.mubr.f32.mxu0 %v569_v41  ;;  %1010 = vmatprep.mubr.f32.mxu1 %v577_v15  ;;  %v572_v22 = vmax.f32 %v556_v17, 0.0  ;;  %v580_v23 = vmax.f32 %v564_v47, 0.0  ;;  %v558_v24 = vadd.f32 %v841_v5, %v537_v20  ;;  %v566_v25 = vadd.f32 %v841_v5, %v545_v50 }
 0x19f   : > { %999 = vmatmul.mubr.f32.vlgmr.msra.gmra.mrb[0].mxu0 %v570_v16  ;;  %1011 = vmatmul.mubr.f32.vlgmr.msra.gmra.mrb[0].mxu1 %v578_v46  ;;  %v573_v26 = vmax.f32 %v557_v18, 0.0  ;;  %v581_v27 = vmax.f32 %v565_v19, 0.0  ;;  %v559_v28 = vadd.f32 %v841_v5, %v538_v51  ;;  %v567_v29 = vadd.f32 %v841_v5, %v546_v21 }
 0x1a0   : > { %1001 = vmatprep.mubr.f32.mxu0 %v571_v44  ;;  %1013 = vmatprep.mubr.f32.mxu1 %v579_v45  ;;  %v574_v30 = vmax.f32 %v558_v24, 0.0  ;;  %v582_v54 = vmax.f32 %v566_v25, 0.0  ;;  %v560_v31 = vadd.f32 %v841_v5, %v539_v48  ;;  %v568_v55 = vadd.f32 %v841_v5, %v547_v49 }
 0x1a1   : > { %v575_v32 = vmax.f32 %v559_v28, 0.0  ;;  %v583_v33 = vmax.f32 %v567_v29, 0.0 }
 0x1a2   : > { %v576_v34 = vmax.f32 %v560_v31, 0.0  ;;  %v584_v35 = vmax.f32 %v568_v55, 0.0 }
 0x1a3   : > { %1002 = vmatmul.mubr.f32.gmra.mrb[2].mxu0 %v572_v22  ;;  %1014 = vmatmul.mubr.f32.gmra.mrb[2].mxu1 %v580_v23 }
 0x1a4   : > { %1004 = vmatprep.mubr.f32.mxu0 %v573_v26  ;;  %1016 = vmatprep.mubr.f32.mxu1 %v581_v27 }
 0x1a7   : > { %1005 = vmatmul.mubr.f32.gmra.mrb[4].mxu0 %v574_v30  ;;  %1017 = vmatmul.mubr.f32.gmra.mrb[4].mxu1 %v582_v54 }
 0x1a8   : > { %1007 = vmatprep.mubr.f32.mxu0 %v575_v32  ;;  %1019 = vmatprep.mubr.f32.mxu1 %v583_v33 }
 0x1ab   : > { %1008 = vmatmul.mubr.f32.gmra.mrb[6].mxu0 %v576_v34  ;;  %1020 = vmatmul.mubr.f32.gmra.mrb[6].mxu1 %v584_v35 }
 0x272   : > { %v1000_v36 = vpop.f32.mrb[0].mxu0  ;;  %v1012_v52 = vpop.f32.mrb[0].mxu1 }
 0x273   : > { %747 = vst [vmem:[%s1543_s6 + $0x8] sm:$0xff] %v1000_v36  ;;  %755 = vst [vmem:[%s1543_s6 + $0x48] sm:$0xff] %v1012_v52  ;;  %v667_v53 = vpop.f32.mrb[1].mxu0  ;;  %v707_v37 = vpop.f32.mrb[1].mxu1 }
 0x274   : > { %746 = vst [vmem:[%s1543_s6] sm:$0xff] %v667_v53  ;;  %754 = vst [vmem:[%s1543_s6 + $0x40] sm:$0xff] %v707_v37 }
 0x276   : > { %v1003_v38 = vpop.f32.mrb[2].mxu0  ;;  %v1015_v39 = vpop.f32.mrb[2].mxu1 }
 0x277   : > { %749 = vst [vmem:[%s1543_s6 + $0x18] sm:$0xff] %v1003_v38  ;;  %757 = vst [vmem:[%s1543_s6 + $0x58] sm:$0xff] %v1015_v39  ;;  %v677_v56 = vpop.f32.mrb[3].mxu0  ;;  %v717_v57 = vpop.f32.mrb[3].mxu1 }
 0x278   : > { %748 = vst [vmem:[%s1543_s6 + $0x10] sm:$0xff] %v677_v56  ;;  %756 = vst [vmem:[%s1543_s6 + $0x50] sm:$0xff] %v717_v57 }
 0x27a   : > { %v1006_v58 = vpop.f32.mrb[4].mxu0  ;;  %v1018_v59 = vpop.f32.mrb[4].mxu1 }
 0x27b   : > { %751 = vst [vmem:[%s1543_s6 + $0x28] sm:$0xff] %v1006_v58  ;;  %759 = vst [vmem:[%s1543_s6 + $0x68] sm:$0xff] %v1018_v59  ;;  %v687_v60 = vpop.f32.mrb[5].mxu0  ;;  %v727_v61 = vpop.f32.mrb[5].mxu1 }
 0x27c   : > { %750 = vst [vmem:[%s1543_s6 + $0x20] sm:$0xff] %v687_v60  ;;  %758 = vst [vmem:[%s1543_s6 + $0x60] sm:$0xff] %v727_v61 }
 0x27e   : > { %v1009_v62 = vpop.f32.mrb[6].mxu0  ;;  %v1021_v63 = vpop.f32.mrb[6].mxu1 }
 0x27f   : > { %753 = vst [vmem:[%s1543_s6 + $0x38] sm:$0xff] %v1009_v62  ;;  %761 = vst [vmem:[%s1543_s6 + $0x78] sm:$0xff] %v1021_v63  ;;  %v697_v0 = vpop.f32.mrb[7].mxu0  ;;  %v737_v1 = vpop.f32.mrb[7].mxu1 }
 0x280   : > { %752 = vst [vmem:[%s1543_s6 + $0x30] sm:$0xff] %v697_v0  ;;  %760 = vst [vmem:[%s1543_s6 + $0x70] sm:$0xff] %v737_v1 }
 0x281 PF: > { %s17_s25 = sadd.s32 1, %s1171_s25   ;;  %s1544_s23 = smov %s1167_s24 }
 0x282   : > { %p14_p6 = scmp.ge.s32.totalorder %s17_s25, 4   ;;  %s1545_s24 = smov %s1547_s0 }
 0x284   :  { %16 = sbr.rel (!%p14_p6) target bundleno = 2 (0x2), region = 86 }

</bundles_post_ra>
